<compile_context>
chip_gen: v6e
topology: v6e:2x2x1
jax: 0.10.0
libtpu: 0.0.40
codegen_flags: <defaults>
</compile_context>

<pallas_src>
import jax
import jax.numpy as jnp
from jax.experimental import pallas as pl
from jax.experimental.pallas import tpu as pltpu


def _fused_mlp_kernel(x_ref, wc_ref, bc_ref, w2_ref, b2_ref, o_ref):
    # x_ref : (Cin, tile)   pixel tile, pixels on lanes
    # wc_ref: (P, Cin)      folded encoder+conv1 weight
    # bc_ref: (P, 1)        folded bias
    # w2_ref: (OUT, P)      conv2 weight
    # b2_ref: (OUT, 1)      conv2 bias
    # o_ref : (OUT, tile)   lane-dense output tile
    x = x_ref[...]
    wc = wc_ref[...]
    cin = x.shape[0]

    # Fused encoder + conv1 as Cin rank-1 VPU FMAs (Cin is tiny, e.g. 2):
    # avoids a K=2 MXU matmul that would pad to the full systolic width.
    h = bc_ref[...]                                   # (P, 1) -> broadcasts
    for c in range(cin):                              # static, tiny trip count
        h = h + wc[:, c:c + 1] * x[c:c + 1, :]        # (P,1)*(1,tile)->(P,tile)

    # ReLU
    h = jnp.maximum(h, 0.0)

    # Conv2d(P, 3, 1): small MXU matmul, output stays lane-dense.
    y = jnp.dot(w2_ref[...], h, preferred_element_type=jnp.float32) + b2_ref[...]

    # Sigmoid
    o_ref[...] = jax.nn.sigmoid(y)


def fused_mlp(x_bcn, wc, bc, w2, b2, *, tile):
    """x_bcn: (B, Cin, N) with N % tile == 0.  Returns (B, OUT, N) float32."""
    b, cin, n = x_bcn.shape
    p = wc.shape[0]
    out_c = w2.shape[0]
    assert n % tile == 0

    grid = (b, n // tile)
    full = lambda bi, j: (0, 0)  # weights: single resident block

    return pl.pallas_call(
        _fused_mlp_kernel,
        out_shape=jax.ShapeDtypeStruct((b, out_c, n), jnp.float32),
        grid_spec=pltpu.PrefetchScalarGridSpec(
            num_scalar_prefetch=0,
            grid=grid,
            in_specs=[
                pl.BlockSpec((None, cin, tile), lambda bi, j: (bi, 0, j)),  # x
                pl.BlockSpec((p, cin), full),                               # Wc
                pl.BlockSpec((p, 1), full),                                 # bc
                pl.BlockSpec((out_c, p), full),                             # W2
                pl.BlockSpec((out_c, 1), full),                             # b2
            ],
            out_specs=pl.BlockSpec((None, out_c, tile),
                                   lambda bi, j: (bi, 0, j)),
        ),
        compiler_params=pltpu.CompilerParams(
            dimension_semantics=("parallel", "parallel")),
    )(x_bcn, wc, bc, w2, b2)


def _choose_tile(hw, max_tile=2048):
    """Largest lane-dense pixel tile: multiple of 128, capped at max_tile."""
    if hw <= max_tile:
        return ((hw + 127) // 128) * 128
    return max_tile


def model_forward(x_nchw, params, *, max_tile=2048):
    """x_nchw: (B, Cin, H, W) float32 -> (B, 3, H, W) float32."""
    b, cin, h, w = x_nchw.shape
    we, be, w1, b1, w2, b2 = params

    # One-time algebraic fold of encoder projection into conv1 (exact up to
    # fp32 reassociation): Wc = W1 @ We (P, Cin), bc = W1 @ be + b1.
    wc = w1 @ we
    bc = (w1 @ be + b1).reshape(-1, 1)
    b2c = b2.reshape(-1, 1)

    hw = h * w
    x_r = x_nchw.reshape(b, cin, hw)      # free reshape: no NCHW transpose

    tile = _choose_tile(hw, max_tile)
    hwp = pl.cdiv(hw, tile) * tile
    if hwp != hw:                         # pad pixel tail to a full tile
        x_r = jnp.pad(x_r, ((0, 0), (0, 0), (0, hwp - hw)))

    y = fused_mlp(x_r, wc, bc, w2, b2c, tile=tile)     # (B, 3, hwp)
    if hwp != hw:
        y = y[:, :, :hw]
    return y.reshape(b, y.shape[1], h, w)              # free reshape back


def init_params(key, cin, encoded_vector_size, num_planes, out_c=3):
    """Deterministic parameter init; weights stored (out, in) like PyTorch."""
    k0, k1, k2 = jax.random.split(key, 3)
    we = jax.random.normal(k0, (encoded_vector_size, cin), jnp.float32) * 0.5
    be = jnp.zeros((encoded_vector_size,), jnp.float32)
    w1 = jax.random.normal(k1, (num_planes, encoded_vector_size),
                           jnp.float32) * (1.0 / jnp.sqrt(encoded_vector_size))
    b1 = jnp.full((num_planes,), 0.01, jnp.float32)
    w2 = jax.random.normal(k2, (out_c, num_planes),
                           jnp.float32) * (1.0 / jnp.sqrt(num_planes))
    b2 = jnp.full((out_c,), -0.1, jnp.float32)
    return (we, be, w1, b1, w2, b2)


def reference_forward(x_nchw, params):
    """Pure-JAX reference (unfused, two matmuls) for correctness checking."""
    we, be, w1, b1, w2, b2 = params
    b, cin, h, w = x_nchw.shape
    x = x_nchw.reshape(b, cin, h * w)
    feat = jnp.einsum('ec,bcn->ben', we, x) + be[None, :, None]
    h1 = jnp.einsum('pe,ben->bpn', w1, feat) + b1[None, :, None]
    h1 = jnp.maximum(h1, 0.0)
    y = jnp.einsum('op,bpn->bon', w2, h1) + b2[None, :, None]
    return jax.nn.sigmoid(y).reshape(b, w2.shape[0], h, w)


if __name__ == "__main__":
    key = jax.random.PRNGKey(0)
    kx, kp = jax.random.split(key)

    # Small shapes: batch=2, 2 input (coordinate) channels, 16x16 spatial,
    # encoded_vector_size=32, num_planes=64.
    B, CIN, H, W = 2, 2, 16, 16
    E, NUM_PLANES = 32, 64

    x = jax.random.normal(kx, (B, CIN, H, W), jnp.float32)
    params = init_params(kp, CIN, E, NUM_PLANES)

    out = model_forward(x, params)
    out = jax.block_until_ready(out)

    assert out.shape == (B, 3, H, W), out.shape
    assert out.dtype == jnp.float32
    # sigmoid output range sanity check
    assert bool(jnp.all(out > 0.0)) and bool(jnp.all(out < 1.0))

    # numerical check against unfused pure-JAX reference
    ref = jax.block_until_ready(reference_forward(x, params))
    assert bool(jnp.all(jnp.abs(out - ref) < 1e-4)), float(
        jnp.max(jnp.abs(out - ref)))

    print("KERNEL_OK")
</pallas_src>

<mosaic_0001>
module attributes {stable_mosaic.version = 11 : i64} {
  func.func @_fused_mlp_kernel(%arg0: i32, %arg1: i32, %arg2: memref<1x2x256xf32, #tpu.memory_space<vmem>>, %arg3: memref<64x2xf32, #tpu.memory_space<vmem>>, %arg4: memref<64x1xf32, #tpu.memory_space<vmem>>, %arg5: memref<3x64xf32, #tpu.memory_space<vmem>>, %arg6: memref<3x1xf32, #tpu.memory_space<vmem>>, %arg7: memref<1x3x256xf32, #tpu.memory_space<vmem>>) attributes {dimension_semantics = [#tpu.dimension_semantics<parallel>, #tpu.dimension_semantics<parallel>], iteration_bounds = array<i64: 2, 1>, scalar_prefetch = 0 : i64, scratch_operands = 0 : i64, tpu.core_type = #tpu.core_type<tc>, window_params = [{transform_indices = @transform_0, window_bounds = array<i64: 1, 2, 256>}, {pipeline_mode = #tpu.pipeline_mode<synchronous>, transform_indices = @transform_1, window_bounds = array<i64: 64, 2>}, {pipeline_mode = #tpu.pipeline_mode<synchronous>, transform_indices = @transform_2, window_bounds = array<i64: 64, 1>}, {pipeline_mode = #tpu.pipeline_mode<synchronous>, transform_indices = @transform_3, window_bounds = array<i64: 3, 64>}, {pipeline_mode = #tpu.pipeline_mode<synchronous>, transform_indices = @transform_4, window_bounds = array<i64: 3, 1>}, {transform_indices = @transform_5, window_bounds = array<i64: 1, 3, 256>}]} {
    %c0 = arith.constant 0 : index
    %c0_0 = arith.constant 0 : index
    %c0_1 = arith.constant 0 : index
    %0 = vector.load %arg2[%c0, %c0_0, %c0_1] : memref<1x2x256xf32, #tpu.memory_space<vmem>>, vector<1x2x256xf32>
    %1 = vector.shape_cast %0 : vector<1x2x256xf32> to vector<2x256xf32>
    %c0_2 = arith.constant 0 : index
    %c0_3 = arith.constant 0 : index
    %2 = vector.load %arg3[%c0_2, %c0_3] : memref<64x2xf32, #tpu.memory_space<vmem>>, vector<64x2xf32>
    %c0_4 = arith.constant 0 : index
    %c0_5 = arith.constant 0 : index
    %3 = vector.load %arg4[%c0_4, %c0_5] : memref<64x1xf32, #tpu.memory_space<vmem>>, vector<64x1xf32>
    %4 = vector.extract_strided_slice %2 {offsets = [0, 0], sizes = [64, 1], strides = [1, 1]} : vector<64x2xf32> to vector<64x1xf32>
    %5 = vector.extract_strided_slice %1 {offsets = [0, 0], sizes = [1, 256], strides = [1, 1]} : vector<2x256xf32> to vector<1x256xf32>
    %6 = vector.broadcast %4 : vector<64x1xf32> to vector<64x256xf32>
    %7 = vector.broadcast %5 : vector<1x256xf32> to vector<64x256xf32>
    %8 = arith.mulf %6, %7 : vector<64x256xf32>
    %9 = vector.broadcast %3 : vector<64x1xf32> to vector<64x256xf32>
    %10 = arith.addf %9, %8 : vector<64x256xf32>
    %11 = vector.extract_strided_slice %2 {offsets = [0, 1], sizes = [64, 1], strides = [1, 1]} : vector<64x2xf32> to vector<64x1xf32>
    %12 = vector.extract_strided_slice %1 {offsets = [1, 0], sizes = [1, 256], strides = [1, 1]} : vector<2x256xf32> to vector<1x256xf32>
    %13 = vector.broadcast %11 : vector<64x1xf32> to vector<64x256xf32>
    %14 = vector.broadcast %12 : vector<1x256xf32> to vector<64x256xf32>
    %15 = arith.mulf %13, %14 : vector<64x256xf32>
    %16 = arith.addf %10, %15 : vector<64x256xf32>
    %cst = arith.constant 0.000000e+00 : f32
    %17 = vector.broadcast %cst : f32 to vector<64x256xf32>
    %18 = arith.maximumf %16, %17 : vector<64x256xf32>
    %c0_6 = arith.constant 0 : index
    %c0_7 = arith.constant 0 : index
    %19 = vector.load %arg5[%c0_6, %c0_7] : memref<3x64xf32, #tpu.memory_space<vmem>>, vector<3x64xf32>
    %cst_8 = arith.constant dense<0.000000e+00> : vector<3x256xf32>
    %20 = tpu.matmul %19, %18, %cst_8 {dimension_numbers = #tpu.dot_dimension_numbers<[1], [0], [0], [1], [0, 0, 1, 1], [], []>} : vector<3x64xf32>, vector<64x256xf32>, vector<3x256xf32> -> vector<3x256xf32>
    %c0_9 = arith.constant 0 : index
    %c0_10 = arith.constant 0 : index
    %21 = vector.load %arg6[%c0_9, %c0_10] : memref<3x1xf32, #tpu.memory_space<vmem>>, vector<3x1xf32>
    %22 = vector.broadcast %21 : vector<3x1xf32> to vector<3x256xf32>
    %23 = arith.addf %20, %22 : vector<3x256xf32>
    %24 = arith.negf %23 : vector<3x256xf32>
    %25 = math.exp %24 : vector<3x256xf32>
    %cst_11 = arith.constant 1.000000e+00 : f32
    %26 = vector.broadcast %cst_11 : f32 to vector<3x256xf32>
    %27 = arith.addf %26, %25 : vector<3x256xf32>
    %28 = arith.divf %26, %27 : vector<3x256xf32>
    %c0_12 = arith.constant 0 : index
    %c0_13 = arith.constant 0 : index
    %c0_14 = arith.constant 0 : index
    %29 = vector.load %arg7[%c0_12, %c0_13, %c0_14] : memref<1x3x256xf32, #tpu.memory_space<vmem>>, vector<1x3x256xf32>
    %30 = vector.shape_cast %29 : vector<1x3x256xf32> to vector<3x256xf32>
    %31 = vector.shape_cast %28 : vector<3x256xf32> to vector<1x3x256xf32>
    tpu.vector_store %arg7[%c0_12, %c0_13, %c0_14], %31 {strides = array<i32>} : memref<1x3x256xf32, #tpu.memory_space<vmem>>, vector<1x3x256xf32>,
    return
  }
  func.func @transform_0(%arg0: i32, %arg1: i32) -> (i32, i32, i32) {
    %c0_i32 = arith.constant 0 : i32
    %c0_i32_0 = arith.constant 0 : i32
    return %arg0, %c0_i32, %arg1 : i32, i32, i32
  }
  func.func @transform_1(%arg0: i32, %arg1: i32) -> (i32, i32) {
    %c0_i32 = arith.constant 0 : i32
    %c0_i32_0 = arith.constant 0 : i32
    %c0_i32_1 = arith.constant 0 : i32
    return %c0_i32, %c0_i32_0 : i32, i32
  }
  func.func @transform_2(%arg0: i32, %arg1: i32) -> (i32, i32) {
    %c0_i32 = arith.constant 0 : i32
    %c0_i32_0 = arith.constant 0 : i32
    %c0_i32_1 = arith.constant 0 : i32
    return %c0_i32, %c0_i32_0 : i32, i32
  }
  func.func @transform_3(%arg0: i32, %arg1: i32) -> (i32, i32) {
    %c0_i32 = arith.constant 0 : i32
    %c0_i32_0 = arith.constant 0 : i32
    %c0_i32_1 = arith.constant 0 : i32
    return %c0_i32, %c0_i32_0 : i32, i32
  }
  func.func @transform_4(%arg0: i32, %arg1: i32) -> (i32, i32) {
    %c0_i32 = arith.constant 0 : i32
    %c0_i32_0 = arith.constant 0 : i32
    %c0_i32_1 = arith.constant 0 : i32
    return %c0_i32, %c0_i32_0 : i32, i32
  }
  func.func @transform_5(%arg0: i32, %arg1: i32) -> (i32, i32, i32) {
    %c0_i32 = arith.constant 0 : i32
    %c0_i32_0 = arith.constant 0 : i32
    return %arg0, %c0_i32, %arg1 : i32, i32, i32
  }
}

</mosaic_0001>

<bundles_post_ra>
// kernel: tpu_custom_call.1
= control target key start
LH: loop header
LB: loop body
LE: loop exit
PB: predicated region body
PF: predicated region fallthrough
CT: control target
= control target key end

     0   :  { %s814_s18 = smov 0   ;;  %s816_s19 = smov 0   ;;  %s953_s0 = inlined_call_operand.vmem [shape: f32[2,2,256], index: 0, kind: input, shape index: {}]   ;;  %s954_s1 = inlined_call_operand.vmem [shape: f32[64,2], index: 1, kind: input, shape index: {}]   ;;  %s955_s2 = inlined_call_operand.vmem [shape: f32[64,1], index: 2, kind: input, shape index: {}]   ;;  %s956_s3 = inlined_call_operand.vmem [shape: f32[3,64], index: 3, kind: input, shape index: {}]   ;;  %s957_s4 = inlined_call_operand.vmem [shape: f32[3,1], index: 4, kind: input, shape index: {}]   ;;  %s958_s5 = inlined_call_operand.vmem [shape: f32[2,3,256], index: 5, kind: output, shape index: {}]  }
   0x1   :  { %s818_s20 = smov 0  }
   0x2 LB: > { %s27_s21 = sadd.s32 1, %s775_s19  ;;  %p700_p0 = scmp.ge.s32.totalorder %s779_s20, 1  ;;  %s779_s20 = sphi %s818_s20, %s15_s20   ;;  %s775_s19 = sphi %s816_s19, %s960_s19   ;;  %s771_s18 = sphi %s814_s18, %s959_s18  }
   0x3   : > { %p29_p1 = scmp.ge.s32.totalorder %s27_s21, 2  ;;  %p208_p2 = scmp.lt.s32.totalorder %s779_s20, 3 }
   0x5   : > { %s962_s21 = smov (%p29_p1, %s27_s21), 0  ;;  %p209_p3 = pnand %p700_p0, %p208_p2 }
   0x6   : > { %p245_p4 = scmp.lt.s32.totalorder (!%p209_p3), %s771_s18, 1 }
   0x7   : > { %212 = sbr.rel (%p209_p3) target bundleno = 432 (0x1b0), region = 40 }
   0xc   : > { %v280_v0 = vld [vmem:[%s955_s2 + $0x38] sm:$0xff]  ;;  %v781_v2 = vmov 0   ;;  %v271_v3 = vld [vmem:[%s954_s1 + $0x30] sm:$0xff]  ;;  %v782_v4 = vmov 1   ;;  %v270_v5 = vld [vmem:[%s954_s1 + $0x28] sm:$0xff]  ;;  %v783_v19 = vmov 0.0   ;;  %v322_v20 = vlaneseq }
   0xd   : > { %v272_v1 = vld [vmem:[%s954_s1 + $0x38] sm:$0xff]  ;;  %740 = vset.pattern.permute.xlu1 %v781_v2  ;;  %739 = vset.pattern.permute.xlu0 %v781_v2  ;;  %v279_v6 = vld [vmem:[%s955_s2 + $0x30] sm:$0xff]  ;;  %v277_v7 = vld [vmem:[%s955_s2 + $0x20] sm:$0xff]  ;;  %s964_s18 = smov (!%p245_p4, %s771_s18), 1  ;;  %vm517_vm0 = vcmask 523264  }
   0xe   : > { %393 = vperm.xlu1 %740, %v280_v0   ;;  %318 = vperm.xlu0 %739, %v272_v1   ;;  %v269_v8 = vld [vmem:[%s954_s1 + $0x20] sm:$0xff]  ;;  %v276_v9 = vld [vmem:[%s955_s2 + $0x18] sm:$0xff]  ;;  %v278_v10 = vld [vmem:[%s955_s2 + $0x28] sm:$0xff]  ;;  %s710_s10 = sshll.u32 %s964_s18, 2  ;;  %v323_v21 = vshrl.u32 %v322_v20, 7  ;;  %s711_s16 = sshll.u32 %s964_s18, 3 }
   0xf   : > { %v266_v11 = vld [vmem:[%s954_s1 + $0x8] sm:$0xff]  ;;  %v268_v12 = vld [vmem:[%s954_s1 + $0x18] sm:$0xff]  ;;  %v267_v13 = vld [vmem:[%s954_s1 + $0x10] sm:$0xff]  ;;  %585 = vmatprep.mubr.f32.mxu0 %v783_v19  ;;  %s252_s13 = scalar_lea.vmem %s953_s0, %s710_s10  ;;  %s262_s23 = scalar_lea.vmem %s958_s5, %s711_s16 }
  0x10   : > { %v265_v14 = vld [vmem:[%s954_s1] sm:$0xff]  ;;  %v275_v15 = vld [vmem:[%s955_s2 + $0x10] sm:$0xff]  ;;  %v274_v16 = vld [vmem:[%s955_s2 + $0x8] sm:$0xff]  ;;  %v324_v22 = vsub.s32 0, %v323_v21  ;;  %v328_v23 = vsub.s32 2, %v323_v21  ;;  %v446_v27 = vsub.s32 1, %v323_v21 }
  0x11   : > { %v273_v17 = vld [vmem:[%s955_s2] sm:$0xff]  ;;  %v450_v28 = vsub.s32 3, %v323_v21 }
  0x12   : > { %741 = vset.pattern.permute.xlu1 %v782_v4  ;;  %313 = vperm.xlu0 %739, %v271_v3   ;;  %v511_v18 = vld [vmem:[%s957_s4] sm:$0x7] }
  0x13   : > { %441 = vperm.xlu1 %741, %v272_v1   ;;  %v264_v24 = vld [vmem:[%s252_s13] sm:$0xf] }
  0x14   : > { %v325_v25 = vrot.slane %v264_v24, %v324_v22  ;;  %v329_v26 = vrot.slane %v264_v24, %v328_v23  ;;  %v447_v31 = vrot.slane %v264_v24, %v446_v27  ;;  %v451_v32 = vrot.slane %v264_v24, %v450_v28 }
  0x16   : > { %308 = vperm.xlu0 %739, %v270_v5   ;;  %v893_v29 = vrot.slane %v325_v25, %v324_v22  ;;  %v895_v30 = vrot.slane %v329_v26, %v324_v22  ;;  %v899_v37 = vrot.slane %v447_v31, %v446_v27  ;;  %v901_v38 = vrot.slane %v451_v32, %v446_v27 }
  0x17   : > { %742 = vset.pattern.permute.xlu1 %v781_v2 }
  0x18   : > { %388 = vperm.xlu1 %742, %v279_v6  }
  0x1a   : > { %378 = vperm.xlu0 %739, %v277_v7  }
  0x1c   : > { %303 = vperm.xlu1 %742, %v269_v8  }
  0x1e   : > { %373 = vperm.xlu0 %739, %v276_v9  }
  0x20   : > { %383 = vperm.xlu1 %742, %v278_v10  }
  0x22   : > { %288 = vperm.xlu0 %739, %v266_v11  }
  0x24   : > { %298 = vperm.xlu1 %742, %v268_v12  }
  0x26   : > { %746 = vset.pattern.permute.xlu0 %v782_v4 }
  0x27   : > { %437 = vperm.xlu0 %746, %v271_v3  }
  0x28   : > { %743 = vset.pattern.permute.xlu1 %v782_v4 }
  0x29   : > { %429 = vperm.xlu1 %743, %v269_v8  }
  0x2b   : > { %433 = vperm.xlu0 %746, %v270_v5  }
  0x2d   : > { %744 = vset.pattern.permute.xlu1 %v781_v2 }
  0x2e   : > { %293 = vperm.xlu1 %744, %v267_v13  }
  0x2f   : > { %421 = vperm.xlu0 %746, %v267_v13  }
  0x32   : > { %745 = vset.pattern.permute.xlu1 %v782_v4 }
  0x33   : > { %425 = vperm.xlu1 %745, %v268_v12   ;;  %417 = vperm.xlu0 %746, %v266_v11  }
  0x37   : > { %747 = vset.pattern.permute.xlu1 %v781_v2  ;;  %413 = vperm.xlu0 %746, %v265_v14  }
  0x38   : > { %368 = vperm.xlu1 %747, %v275_v15  }
  0x3b   : > { %748 = vset.pattern.permute.xlu0 %v781_v2 }
  0x3c   : > { %283 = vperm.xlu1 %747, %v265_v14  }
  0x40   : > { %363 = vperm.xlu1 %747, %v274_v16  }
  0x44   : > { %358 = vperm.xlu1 %747, %v273_v17  }
  0x48   : > { %514 = vperm.xlu1 %747, %v511_v18  }
  0x89   : > { %v394_v33 = vpop.permute.xlu1 %393  ;;  %v319_v34 = vpop.permute.xlu0 %318 }
  0x8a   : > { %v354_v35 = vmul.f32 %v893_v29, %v319_v34  ;;  %v355_v36 = vmul.f32 %v895_v30, %v319_v34 }
  0x8c   : > { %v410_v41 = vadd.f32 %v394_v33, %v354_v35  ;;  %v411_v44 = vadd.f32 %v394_v33, %v355_v36 }
  0x8d   : > { %v314_v39 = vpop.permute.xlu0 %313 }
  0x8e   : > { %v442_v40 = vpop.permute.xlu1 %441  ;;  %v352_v56 = vmul.f32 %v893_v29, %v314_v39  ;;  %v353_v57 = vmul.f32 %v895_v30, %v314_v39 }
  0x8f   : > { %v476_v42 = vmul.f32 %v899_v37, %v442_v40  ;;  %v477_v43 = vmul.f32 %v901_v38, %v442_v40 }
  0x91   : > { %v309_v45 = vpop.permute.xlu0 %308  ;;  %v493_v46 = vadd.f32 %v477_v43, %v411_v44  ;;  %v492_v47 = vadd.f32 %v476_v42, %v410_v41 }
  0x92   : > { %v350_v1 = vmul.f32 %v893_v29, %v309_v45  ;;  %v351_v4 = vmul.f32 %v895_v30, %v309_v45 }
  0x93   : > { %v389_v48 = vpop.permute.xlu1 %388  ;;  %v509_v49 = vmax.f32 %v493_v46, 0.0  ;;  %v508_v50 = vmax.f32 %v492_v47, 0.0 }
  0x94   : > { %v408_v61 = vadd.f32 %v389_v48, %v352_v56  ;;  %v409_v62 = vadd.f32 %v389_v48, %v353_v57 }
  0x95   : > { %v379_v51 = vpop.permute.xlu0 %378  ;;  %537 = vmatprep.subr.mxu0 %v509_v49 }
  0x96   : > { %538 = vmatpush1.msra.mxu0 %v508_v50 }
  0x97   : > { %v304_v52 = vpop.permute.xlu1 %303 }
  0x98   : > { %v349_v59 = vmul.f32 %v895_v30, %v304_v52  ;;  %v348_v2 = vmul.f32 %v893_v29, %v304_v52 }
  0x99   : > { %v374_v53 = vpop.permute.xlu0 %373 }
  0x9a   : > { %v405_v8 = vadd.f32 %v379_v51, %v349_v59  ;;  %v404_v15 = vadd.f32 %v379_v51, %v348_v2 }
  0x9b   : > { %v384_v54 = vpop.permute.xlu1 %383 }
  0x9c   : > { %v406_v11 = vadd.f32 %v384_v54, %v350_v1  ;;  %v407_v12 = vadd.f32 %v384_v54, %v351_v4 }
  0x9d   : > { %v905_v55 = vpop.permute.xlu0 %288 }
  0x9e   : > { %v342_v57 = vmul.f32 %v893_v29, %v905_v55 }
  0x9f   : > { %v299_v58 = vpop.permute.xlu1 %298 }
  0xa0   : > { %v346_v23 = vmul.f32 %v893_v29, %v299_v58  ;;  %v347_v24 = vmul.f32 %v895_v30, %v299_v58  ;;  %v343_v58 = vmul.f32 %v895_v30, %v905_v55 }
  0xa2   : > { %v438_v60 = vpop.permute.xlu0 %437  ;;  %v402_v32 = vadd.f32 %v374_v53, %v346_v23  ;;  %v403_v33 = vadd.f32 %v374_v53, %v347_v24 }
  0xa3   : > { %v474_v63 = vmul.f32 %v899_v37, %v438_v60  ;;  %v475_v0 = vmul.f32 %v901_v38, %v438_v60 }
  0xa4   : > { %v430_v3 = vpop.permute.xlu1 %429 }
  0xa5   : > { %v490_v5 = vadd.f32 %v474_v63, %v408_v61  ;;  %v491_v6 = vadd.f32 %v475_v0, %v409_v62  ;;  %v471_v7 = vmul.f32 %v901_v38, %v430_v3  ;;  %v470_v9 = vmul.f32 %v899_v37, %v430_v3 }
  0xa6   : > { %v434_v10 = vpop.permute.xlu0 %433 }
  0xa7   : > { %v472_v13 = vmul.f32 %v899_v37, %v434_v10  ;;  %v473_v14 = vmul.f32 %v901_v38, %v434_v10  ;;  %v507_v16 = vmax.f32 %v491_v6, 0.0  ;;  %v506_v17 = vmax.f32 %v490_v5, 0.0 }
  0xa8   : > { %v487_v18 = vadd.f32 %v471_v7, %v405_v8  ;;  %v486_v22 = vadd.f32 %v470_v9, %v404_v15 }
  0xa9   : > { %v488_v19 = vadd.f32 %v472_v13, %v406_v11  ;;  %v489_v20 = vadd.f32 %v473_v14, %v407_v12  ;;  %v294_v21 = vpop.permute.xlu1 %293  ;;  %539 = vmatprep.subr.mxu0 %v507_v16 }
  0xaa   : > { %540 = vmatpush1.msra.mxu0 %v506_v17  ;;  %v503_v27 = vmax.f32 %v487_v18, 0.0  ;;  %v502_v31 = vmax.f32 %v486_v22, 0.0  ;;  %v422_v36 = vpop.permute.xlu0 %421  ;;  %v344_v41 = vmul.f32 %v893_v29, %v294_v21  ;;  %v345_v42 = vmul.f32 %v895_v30, %v294_v21 }
  0xab   : > { %v505_v25 = vmax.f32 %v489_v20, 0.0  ;;  %v504_v26 = vmax.f32 %v488_v19, 0.0  ;;  %v466_v46 = vmul.f32 %v899_v37, %v422_v36  ;;  %v467_v47 = vmul.f32 %v901_v38, %v422_v36 }
  0xad   : > { %541 = vmatprep.subr.mxu0 %v505_v25 }
  0xae   : > { %v426_v28 = vpop.permute.xlu1 %425  ;;  %542 = vmatpush1.msra.mxu0 %v504_v26  ;;  %v418_v50 = vpop.permute.xlu0 %417 }
  0xaf   : > { %v468_v34 = vmul.f32 %v899_v37, %v426_v28  ;;  %v469_v35 = vmul.f32 %v901_v38, %v426_v28  ;;  %543 = vmatprep.subr.mxu0 %v503_v27  ;;  %v464_v60 = vmul.f32 %v899_v37, %v418_v50  ;;  %v465_v61 = vmul.f32 %v901_v38, %v418_v50 }
  0xb0   : > { %544 = vmatpush1.msra.mxu0 %v502_v31 }
  0xb1   : > { %v484_v39 = vadd.f32 %v468_v34, %v402_v32  ;;  %v485_v40 = vadd.f32 %v469_v35, %v403_v33 }
  0xb2   : > { %v414_v62 = vpop.permute.xlu0 %413 }
  0xb3   : > { %v369_v43 = vpop.permute.xlu1 %368  ;;  %v501_v44 = vmax.f32 %v485_v40, 0.0  ;;  %v500_v45 = vmax.f32 %v484_v39, 0.0  ;;  %v462_v5 = vmul.f32 %v899_v37, %v414_v62  ;;  %v463_v55 = vmul.f32 %v901_v38, %v414_v62 }
  0xb4   : > { %v400_v48 = vadd.f32 %v369_v43, %v344_v41  ;;  %v401_v49 = vadd.f32 %v369_v43, %v345_v42 }
  0xb5   : > { %545 = vmatprep.subr.mxu0 %v501_v44 }
  0xb6   : > { %v482_v51 = vadd.f32 %v466_v46, %v400_v48  ;;  %v483_v52 = vadd.f32 %v467_v47, %v401_v49  ;;  %546 = vmatpush1.msra.mxu0 %v500_v45 }
  0xb7   : > { %v284_v53 = vpop.permute.xlu1 %283 }
  0xb8   : > { %v499_v54 = vmax.f32 %v483_v52, 0.0  ;;  %v498_v56 = vmax.f32 %v482_v51, 0.0  ;;  %v340_v1 = vmul.f32 %v893_v29, %v284_v53  ;;  %v341_v2 = vmul.f32 %v895_v30, %v284_v53  ;;  %v510_v29 = vld [vmem:[%s956_s3] sm:$0x7] }
  0xba   : > { %547 = vmatprep.subr.mxu0 %v499_v54 }
  0xbb   : > { %v364_v59 = vpop.permute.xlu1 %363  ;;  %548 = vmatpush1.msra.mxu0 %v498_v56 }
  0xbc   : > { %v398_v63 = vadd.f32 %v364_v59, %v342_v57  ;;  %v399_v0 = vadd.f32 %v364_v59, %v343_v58 }
  0xbe   : > { %v480_v3 = vadd.f32 %v464_v60, %v398_v63  ;;  %v481_v4 = vadd.f32 %v465_v61, %v399_v0 }
  0xbf   : > { %v359_v6 = vpop.permute.xlu1 %358 }
  0xc0   : > { %v396_v7 = vadd.f32 %v359_v6, %v340_v1  ;;  %v397_v8 = vadd.f32 %v359_v6, %v341_v2  ;;  %v497_v9 = vmax.f32 %v481_v4, 0.0  ;;  %v496_v10 = vmax.f32 %v480_v3, 0.0 }
  0xc2   : > { %v478_v11 = vadd.f32 %v462_v5, %v396_v7  ;;  %v479_v12 = vadd.f32 %v463_v55, %v397_v8  ;;  %549 = vmatprep.subr.mxu0 %v497_v9 }
  0xc3   : > { %550 = vmatpush1.msra.mxu0 %v496_v10  ;;  %v515_v30 = vpop.permute.xlu1 %514 }
  0xc4   : > { %v495_v13 = vmax.f32 %v479_v12, 0.0  ;;  %v494_v14 = vmax.f32 %v478_v11, 0.0 }
  0xc6   : > { %551 = vmatprep.subr.mxu0 %v495_v13 }
  0xc7   : > { %552 = vmatpush1.msra.mxu0 %v494_v14 }
  0xc8   : > { %705 = vmatmul.mubr.msk.f32.vlgmr.msra.gmra.mxu0 %vm517_vm0, %v510_v29 }
 0x188   : > { %v587_v37 = vpop.f32.mrf.mxu0 }
 0x189   : > { %v588_v38 = vadd.f32 %v587_v37, %v515_v30 }
 0x18a   : > { %v589_v15 = vpop.f32.mrf.mxu0 }
 0x18b   : > { %v706_v16 = vmul.f32 -1.442695, %v588_v38  ;;  %v590_v17 = vadd.f32 %v589_v15, %v515_v30 }
 0x18d   : > { %749 = vpow2.f32 %v706_v16  ;;  %v707_v18 = vmul.f32 -1.442695, %v590_v17 }
 0x18f   : > { %751 = vpow2.f32 %v707_v18 }
 0x19a   : > { %v750_v19 = vpop.eup %749 }
 0x19b   : > { %v598_v20 = vadd.f32 1.0, %v750_v19 }
 0x19c   : > { %v752_v21 = vpop.eup %751 }
 0x19d   : > { %v599_v22 = vadd.f32 1.0, %v752_v21  ;;  %753 = vrcp.f32 %v598_v20 }
 0x19f   : > { %755 = vrcp.f32 %v599_v22 }
 0x1aa   : > { %v754_v23 = vpop.eup %753 }
 0x1ac   : > { %v756_v24 = vpop.eup %755 }
 0x1ad   : > { %v606_v25 = vcombine.low %v754_v23, %v756_v24 }
 0x1af   : > { %608 = vst [vmem:[%s262_s23] sm:$0x77] %v606_v25 }
 0x1b0 PF: > { %s15_s20 = sadd.s32 1, %s779_s20   ;;  %s959_s18 = smov %s775_s19 }
 0x1b1   : > { %p12_p5 = scmp.ge.s32.totalorder %s15_s20, 4   ;;  %s960_s19 = smov %s962_s21 }
 0x1b3   :  { %14 = sbr.rel (!%p12_p5) target bundleno = 2 (0x2), region = 70 }

</bundles_post_ra>
